<compile_context>
chip_gen: v7x
topology: tpu7x:2x2x1
jax: 0.10.0
libtpu: 0.0.40
codegen_flags: <defaults>
</compile_context>

<pallas_src>
import functools

import jax
import jax.numpy as jnp
from jax.experimental import pallas as pl
from jax.experimental.pallas import tpu as pltpu

LANES = 128
SUBLANES = 8


def _row_align(dtype):
    """Sublane row alignment for a dtype: 8 (32-bit), 16 (16-bit), 32 (8-bit)."""
    itemsize = jnp.dtype(dtype).itemsize
    return SUBLANES * max(1, 4 // max(1, itemsize))


def _default_num_splits():
    """2-way grid split only pays off on chips with 2 TensorCores (v7x)."""
    try:
        kind = jax.devices()[0].device_kind.lower()
    except Exception:
        return 1
    return 2 if ("v7" in kind or "7x" in kind) else 1


def _bce_blur_kernel(pred_ref, true_ref, out_ref, *, inv_alpha, n_valid,
                     block_rows, nblocks, blocks_per_split):
    c = pl.program_id(0)            # split index (TensorCore on v7x)
    i = pl.program_id(1)            # block index within the split
    gb = c * blocks_per_split + i   # logical global block index

    @pl.when(i == 0)
    def _():
        out_ref[...] = jnp.zeros_like(out_ref)

    x = pred_ref[...].astype(jnp.float32)
    y = true_ref[...].astype(jnp.float32)

    # BCEWithLogitsLoss(reduction='none'), numerically stable form:
    #   loss = max(x, 0) - x*y + log(1 + exp(-|x|))
    e = jnp.exp(-jnp.abs(x))                    # reused by log1p AND sigmoid
    bce = jnp.maximum(x, 0.0) - x * y + jnp.log1p(e)

    # sigmoid(x) rebuilt from e: 1/(1+e) for x>=0, e/(1+e) for x<0.
    # Approx EUP reciprocal + one Newton step is ~f32-exact and cheaper than a
    # full-precision divide chain (matters on v7x where this can be EUP-bound).
    d = 1.0 + e
    r = pl.reciprocal(d, approx=True)
    r = r * (2.0 - d * r)                       # one Newton-Raphson refinement
    p = jnp.where(x >= 0.0, r, e * r)

    # alpha_factor = 1 - exp((dx - 1) / (alpha + 1e-4)); divide pre-folded.
    alpha_factor = 1.0 - jnp.exp((p - y - 1.0) * inv_alpha)
    loss = bce * alpha_factor

    def _partial(v):
        # (block_rows, 128) -> (8, 128) vreg-shaped partial sum. block_rows is
        # always a multiple of 8, so this reshape is a tile-aligned relabel
        # (no VMEM copy) and the reduce is plain vreg adds on the VPU; the
        # expensive cross-lane reduce happens once in the wrapper.
        return v.reshape(-1, SUBLANES, LANES).sum(axis=0)

    @pl.when(gb < nblocks - 1)
    def _():
        out_ref[...] += _partial(loss)

    @pl.when(gb >= nblocks - 1)
    def _():
        # Final logical block (and any clamped duplicate block of an uneven
        # split): mask padded / out-of-range / garbage rows.  Keep the
        # jnp.where (selects 0.0) -- a multiply-by-mask would propagate
        # NaN/Inf from the uninitialized VMEM region of a ragged last block.
        row = jax.lax.broadcasted_iota(jnp.int32, loss.shape, 0)
        col = jax.lax.broadcasted_iota(jnp.int32, loss.shape, 1)
        flat = (gb * block_rows + row) * LANES + col
        out_ref[...] += _partial(jnp.where(flat < n_valid, loss, 0.0))


def bce_blur_with_logits_loss(pred, true, alpha=0.05, block_rows=4096,
                              num_splits=None):
    """Returns scalar mean(BCEWithLogits(pred, true) * blur_factor)."""
    assert pred.shape == true.shape
    n_valid = pred.size
    assert n_valid > 0

    if num_splits is None:
        num_splits = _default_num_splits()

    row_align = max(_row_align(pred.dtype), _row_align(true.dtype))

    pred_flat = pred.reshape(-1)
    true_flat = true.reshape(-1)

    # View as a lane-dense (rows, 128) slab.  Common case (size % 128 == 0 and
    # size >= row_align*128): pure reshape, zero extra HBM traffic.  Only odd
    # tails / tiny inputs pad.
    n_padded = max(pl.cdiv(n_valid, LANES) * LANES, row_align * LANES)
    if n_padded != n_valid:
        # TODO(synk): for large inputs whose size % 128 != 0 this pad is a full
        # extra HBM pass; a separate tiny masked tail step would avoid it.
        pred_flat = jnp.pad(pred_flat, (0, n_padded - n_valid))
        true_flat = jnp.pad(true_flat, (0, n_padded - n_valid))
    rows = n_padded // LANES
    pred2 = pred_flat.reshape(rows, LANES)
    true2 = true_flat.reshape(rows, LANES)

    # Row-block size: big (4 MiB/step @ f32 default) to amortize the
    # ~0.35 us/step grid overhead; aligned to the widest-packed input dtype.
    block_rows = max(row_align,
                     (min(int(block_rows), rows) // row_align) * row_align)
    nblocks = pl.cdiv(rows, block_rows)

    # Leading split axis: only >1 on 2-TensorCore chips (v7x).
    num_splits = int(num_splits) if nblocks >= int(num_splits) else 1
    blocks_per_split = pl.cdiv(nblocks, num_splits)

    # Kernel mask math is int32.
    assert num_splits * blocks_per_split * block_rows * LANES < 2 ** 31, (
        "input too large for int32 flat-index math in the kernel")

    def in_map(c, i):
        # Clamp so an uneven split never issues an out-of-range block DMA;
        # the duplicated block is fully masked out inside the kernel.
        return (jnp.minimum(c * blocks_per_split + i, nblocks - 1), 0)

    kernel = functools.partial(
        _bce_blur_kernel,
        inv_alpha=1.0 / (float(alpha) + 1e-4),   # fold the divide at trace time
        n_valid=n_valid, block_rows=block_rows, nblocks=nblocks,
        blocks_per_split=blocks_per_split)

    # Double-buffered inputs must fit scoped VMEM (v5e default is only 16 MiB).
    block_bytes = block_rows * LANES * (pred2.dtype.itemsize +
                                        true2.dtype.itemsize)
    vmem_limit = int(max(32 * 1024 * 1024, 2 * block_bytes + (4 << 20)))

    partials = pl.pallas_call(
        kernel,
        out_shape=jax.ShapeDtypeStruct((num_splits * SUBLANES, LANES),
                                       jnp.float32),
        grid_spec=pltpu.PrefetchScalarGridSpec(
            num_scalar_prefetch=0,
            grid=(num_splits, blocks_per_split),
            in_specs=[
                pl.BlockSpec((block_rows, LANES), in_map),
                pl.BlockSpec((block_rows, LANES), in_map),
            ],
            out_specs=pl.BlockSpec((SUBLANES, LANES), lambda c, i: (c, 0)),
        ),
        # TODO(synk): on v7x, verify in the trace that the leading "parallel"
        # axis really shards across both TensorCores; if not, switch it to
        # pltpu.CORE_PARALLEL.
        compiler_params=pltpu.CompilerParams(
            dimension_semantics=("parallel", "arbitrary"),
            vmem_limit_bytes=vmem_limit),
    )(pred2, true2)

    # One cross-lane reduction + mean, outside the per-step loop.
    return jnp.sum(partials) / jnp.float32(n_valid)


def _reference(pred, true, alpha=0.05):
    x = pred.astype(jnp.float32)
    y = true.astype(jnp.float32)
    loss = jnp.maximum(x, 0.0) - x * y + jnp.log1p(jnp.exp(-jnp.abs(x)))
    p = jax.nn.sigmoid(x)
    loss = loss * (1.0 - jnp.exp(((p - y) - 1.0) / (alpha + 1e-4)))
    return jnp.mean(loss)


if __name__ == "__main__":
    key = jax.random.PRNGKey(0)
    ks = jax.random.split(key, 10)

    # 1) Primary small NCHW test (module has no learned parameters).
    pred = jax.random.normal(ks[0], (2, 4, 16, 16), dtype=jnp.float32)
    true = (jax.random.uniform(ks[1], (2, 4, 16, 16)) > 0.5).astype(jnp.float32)
    out = jax.block_until_ready(bce_blur_with_logits_loss(pred, true))
    ref = _reference(pred, true)
    assert jnp.allclose(out, ref, atol=1e-5, rtol=1e-4), (out, ref)

    # 2) Multi-block + uneven 2-way split (exercises the clamped extra step),
    #    bf16 labels (reduced HBM traffic path), small block_rows override.
    pred2 = jax.random.normal(ks[2], (2, 8, 96, 96), dtype=jnp.float32)
    true2 = (jax.random.uniform(ks[3], (2, 8, 96, 96)) > 0.5).astype(jnp.bfloat16)
    out2 = jax.block_until_ready(
        bce_blur_with_logits_loss(pred2, true2, block_rows=256, num_splits=2))
    ref2 = _reference(pred2, true2)
    assert jnp.allclose(out2, ref2, atol=1e-5, rtol=1e-4), (out2, ref2)

    # 3) Odd size (not a multiple of 128): tail-pad path + 2-way split with a
    #    ragged final block.
    pred3 = jax.random.normal(ks[4], (262921,), dtype=jnp.float32)
    true3 = (jax.random.uniform(ks[5], (262921,)) > 0.5).astype(jnp.float32)
    out3 = jax.block_until_ready(
        bce_blur_with_logits_loss(pred3, true3, num_splits=2))
    ref3 = _reference(pred3, true3)
    assert jnp.allclose(out3, ref3, atol=1e-5, rtol=1e-4), (out3, ref3)

    # 4) Both inputs bf16 (halves HBM traffic on mem-bound v5e/v6e).
    pred4 = jax.random.normal(ks[6], (2, 4, 32, 32), dtype=jnp.bfloat16)
    true4 = (jax.random.uniform(ks[7], (2, 4, 32, 32)) > 0.5).astype(jnp.bfloat16)
    out4 = jax.block_until_ready(bce_blur_with_logits_loss(pred4, true4))
    ref4 = _reference(pred4, true4)
    assert jnp.allclose(out4, ref4, atol=1e-5, rtol=1e-4), (out4, ref4)

    # 5) Default big-block path (size % 128 == 0, no pad, auto num_splits).
    pred5 = jax.random.normal(ks[8], (2, 4, 128, 128), dtype=jnp.float32)
    true5 = (jax.random.uniform(ks[9], (2, 4, 128, 128)) > 0.5).astype(jnp.float32)
    out5 = jax.block_until_ready(bce_blur_with_logits_loss(pred5, true5))
    ref5 = _reference(pred5, true5)
    assert jnp.allclose(out5, ref5, atol=1e-5, rtol=1e-4), (out5, ref5)

    print("KERNEL_OK")
</pallas_src>

<mosaic_0001>
module attributes {stable_mosaic.version = 11 : i64} {
  func.func @_bce_blur_kernel(%arg0: i32, %arg1: i32, %arg2: memref<16x128xf32, #tpu.memory_space<vmem>>, %arg3: memref<16x128xf32, #tpu.memory_space<vmem>>, %arg4: memref<8x128xf32, #tpu.memory_space<vmem>>) attributes {dimension_semantics = [#tpu.dimension_semantics<parallel>, #tpu.dimension_semantics<arbitrary>], iteration_bounds = array<i64: 1, 1>, scalar_prefetch = 0 : i64, scratch_operands = 0 : i64, tpu.core_type = #tpu.core_type<tc>, window_params = [{transform_indices = @transform_0, window_bounds = array<i64: 16, 128>}, {transform_indices = @transform_1, window_bounds = array<i64: 16, 128>}, {transform_indices = @transform_2, window_bounds = array<i64: 8, 128>}]} {
    %c1_i32 = arith.constant 1 : i32
    %0 = arith.muli %arg0, %c1_i32 : i32
    %1 = arith.addi %0, %arg1 : i32
    %c0_i32 = arith.constant 0 : i32
    %2 = arith.cmpi eq, %arg1, %c0_i32 : i32
    %3 = arith.extui %2 : i1 to i32
    %c0_i32_0 = arith.constant 0 : i32
    %4 = arith.cmpi ne, %3, %c0_i32_0 : i32
    scf.if %4 {
      %cst_15 = arith.constant 0.000000e+00 : f32
      %43 = vector.broadcast %cst_15 : f32 to vector<8x128xf32>
      %c0_16 = arith.constant 0 : index
      %c0_17 = arith.constant 0 : index
      %44 = vector.load %arg4[%c0_16, %c0_17] : memref<8x128xf32, #tpu.memory_space<vmem>>, vector<8x128xf32>
      tpu.vector_store %arg4[%c0_16, %c0_17], %43 {strides = array<i32>} : memref<8x128xf32, #tpu.memory_space<vmem>>, vector<8x128xf32>,
    } else {
    }
    %c0 = arith.constant 0 : index
    %c0_1 = arith.constant 0 : index
    %5 = vector.load %arg2[%c0, %c0_1] : memref<16x128xf32, #tpu.memory_space<vmem>>, vector<16x128xf32>
    %c0_2 = arith.constant 0 : index
    %c0_3 = arith.constant 0 : index
    %6 = vector.load %arg3[%c0_2, %c0_3] : memref<16x128xf32, #tpu.memory_space<vmem>>, vector<16x128xf32>
    %7 = math.absf %5 : vector<16x128xf32>
    %cst = arith.constant 0.000000e+00 : f32
    %8 = vector.broadcast %cst : f32 to vector<16x128xf32>
    %9 = arith.subf %8, %7 : vector<16x128xf32>
    %10 = math.exp %9 : vector<16x128xf32>
    %cst_4 = arith.constant 0.000000e+00 : f32
    %11 = vector.broadcast %cst_4 : f32 to vector<16x128xf32>
    %12 = arith.maximumf %5, %11 : vector<16x128xf32>
    %13 = arith.mulf %5, %6 : vector<16x128xf32>
    %14 = arith.subf %12, %13 : vector<16x128xf32>
    %15 = math.log1p %10 : vector<16x128xf32>
    %16 = arith.addf %14, %15 : vector<16x128xf32>
    %cst_5 = arith.constant 1.000000e+00 : f32
    %17 = vector.broadcast %cst_5 : f32 to vector<16x128xf32>
    %18 = arith.addf %17, %10 : vector<16x128xf32>
    %19 = tpu.reciprocal %18 {approx = true} : vector<16x128xf32> -> vector<16x128xf32>
    %20 = arith.mulf %18, %19 : vector<16x128xf32>
    %cst_6 = arith.constant 2.000000e+00 : f32
    %21 = vector.broadcast %cst_6 : f32 to vector<16x128xf32>
    %22 = arith.subf %21, %20 : vector<16x128xf32>
    %23 = arith.mulf %19, %22 : vector<16x128xf32>
    %cst_7 = arith.constant 0.000000e+00 : f32
    %24 = vector.broadcast %cst_7 : f32 to vector<16x128xf32>
    %25 = arith.cmpf oge, %5, %24 : vector<16x128xf32>
    %26 = arith.mulf %10, %23 : vector<16x128xf32>
    %27 = arith.select %25, %23, %26 : vector<16x128xi1>, vector<16x128xf32>
    %28 = arith.subf %27, %6 : vector<16x128xf32>
    %cst_8 = arith.constant 1.000000e+00 : f32
    %29 = vector.broadcast %cst_8 : f32 to vector<16x128xf32>
    %30 = arith.subf %28, %29 : vector<16x128xf32>
    %cst_9 = arith.constant 19.9600792 : f32
    %31 = vector.broadcast %cst_9 : f32 to vector<16x128xf32>
    %32 = arith.mulf %30, %31 : vector<16x128xf32>
    %33 = math.exp %32 : vector<16x128xf32>
    %cst_10 = arith.constant 1.000000e+00 : f32
    %34 = vector.broadcast %cst_10 : f32 to vector<16x128xf32>
    %35 = arith.subf %34, %33 : vector<16x128xf32>
    %36 = arith.mulf %16, %35 : vector<16x128xf32>
    %c0_i32_11 = arith.constant 0 : i32
    %37 = arith.cmpi slt, %1, %c0_i32_11 : i32
    %38 = arith.extui %37 : i1 to i32
    %c0_i32_12 = arith.constant 0 : i32
    %39 = arith.cmpi ne, %38, %c0_i32_12 : i32
    scf.if %39 {
      %c0_15 = arith.constant 0 : index
      %c0_16 = arith.constant 0 : index
      %43 = vector.load %arg4[%c0_15, %c0_16] : memref<8x128xf32, #tpu.memory_space<vmem>>, vector<8x128xf32>
      %44 = vector.shape_cast %36 : vector<16x128xf32> to vector<2x8x128xf32>
      %cst_17 = arith.constant dense<0.000000e+00> : vector<8x128xf32>
      %45 = vector.multi_reduction <add>, %44, %cst_17 [0] : vector<2x8x128xf32> to vector<8x128xf32>
      %46 = arith.addf %43, %45 : vector<8x128xf32>
      %c0_18 = arith.constant 0 : index
      %c0_19 = arith.constant 0 : index
      %47 = vector.load %arg4[%c0_18, %c0_19] : memref<8x128xf32, #tpu.memory_space<vmem>>, vector<8x128xf32>
      tpu.vector_store %arg4[%c0_18, %c0_19], %46 {strides = array<i32>} : memref<8x128xf32, #tpu.memory_space<vmem>>, vector<8x128xf32>,
    } else {
    }
    %c0_i32_13 = arith.constant 0 : i32
    %40 = arith.cmpi sge, %1, %c0_i32_13 : i32
    %41 = arith.extui %40 : i1 to i32
    %c0_i32_14 = arith.constant 0 : i32
    %42 = arith.cmpi ne, %41, %c0_i32_14 : i32
    scf.if %42 {
      %43 = tpu.iota {dimensions = array<i32: 0>} : vector<16x128xi32>
      %44 = tpu.iota {dimensions = array<i32: 1>} : vector<16x128xi32>
      %c16_i32 = arith.constant 16 : i32
      %45 = arith.muli %1, %c16_i32 : i32
      %46 = vector.broadcast %45 : i32 to vector<16x128xi32>
      %47 = arith.addi %46, %43 : vector<16x128xi32>
      %c128_i32 = arith.constant 128 : i32
      %48 = vector.broadcast %c128_i32 : i32 to vector<16x128xi32>
      %49 = arith.muli %47, %48 : vector<16x128xi32>
      %50 = arith.addi %49, %44 : vector<16x128xi32>
      %c0_15 = arith.constant 0 : index
      %c0_16 = arith.constant 0 : index
      %51 = vector.load %arg4[%c0_15, %c0_16] : memref<8x128xf32, #tpu.memory_space<vmem>>, vector<8x128xf32>
      %c2048_i32 = arith.constant 2048 : i32
      %52 = vector.broadcast %c2048_i32 : i32 to vector<16x128xi32>
      %53 = arith.cmpi slt, %50, %52 : vector<16x128xi32>
      %cst_17 = arith.constant 0.000000e+00 : f32
      %54 = vector.broadcast %cst_17 : f32 to vector<16x128xf32>
      %55 = arith.select %53, %36, %54 : vector<16x128xi1>, vector<16x128xf32>
      %56 = vector.shape_cast %55 : vector<16x128xf32> to vector<2x8x128xf32>
      %cst_18 = arith.constant dense<0.000000e+00> : vector<8x128xf32>
      %57 = vector.multi_reduction <add>, %56, %cst_18 [0] : vector<2x8x128xf32> to vector<8x128xf32>
      %58 = arith.addf %51, %57 : vector<8x128xf32>
      %c0_19 = arith.constant 0 : index
      %c0_20 = arith.constant 0 : index
      %59 = vector.load %arg4[%c0_19, %c0_20] : memref<8x128xf32, #tpu.memory_space<vmem>>, vector<8x128xf32>
      tpu.vector_store %arg4[%c0_19, %c0_20], %58 {strides = array<i32>} : memref<8x128xf32, #tpu.memory_space<vmem>>, vector<8x128xf32>,
    } else {
    }
    return
  }
  func.func @transform_0(%arg0: i32, %arg1: i32) -> (i32, i32) {
    %c1_i32 = arith.constant 1 : i32
    %0 = arith.muli %arg0, %c1_i32 : i32
    %1 = arith.addi %0, %arg1 : i32
    %c0_i32 = arith.constant 0 : i32
    %2 = arith.minsi %1, %c0_i32 : i32
    %c0_i32_0 = arith.constant 0 : i32
    %c0_i32_1 = arith.constant 0 : i32
    return %2, %c0_i32_0 : i32, i32
  }
  func.func @transform_1(%arg0: i32, %arg1: i32) -> (i32, i32) {
    %c1_i32 = arith.constant 1 : i32
    %0 = arith.muli %arg0, %c1_i32 : i32
    %1 = arith.addi %0, %arg1 : i32
    %c0_i32 = arith.constant 0 : i32
    %2 = arith.minsi %1, %c0_i32 : i32
    %c0_i32_0 = arith.constant 0 : i32
    %c0_i32_1 = arith.constant 0 : i32
    return %2, %c0_i32_0 : i32, i32
  }
  func.func @transform_2(%arg0: i32, %arg1: i32) -> (i32, i32) {
    %c0_i32 = arith.constant 0 : i32
    %c0_i32_0 = arith.constant 0 : i32
    return %arg0, %c0_i32 : i32, i32
  }
}

</mosaic_0001>

<bundles_post_ra>
// kernel: tpu_custom_call.1
= control target key start
LH: loop header
LB: loop body
LE: loop exit
PB: predicated region body
PF: predicated region fallthrough
CT: control target
= control target key end

     0   :  { %7 = vsyncpa [#allocation3], 0  ;;  %s351_s0 = inlined_call_operand.hbm [shape: f32[16,128], index: 0, kind: input, shape index: {}]   ;;  %s352_s1 = inlined_call_operand.hbm [shape: f32[16,128], index: 1, kind: input, shape index: {}]   ;;  %s353_s2 = inlined_call_operand.hbm [shape: f32[8,128], index: 2, kind: output, shape index: {}]  }
   0x1   :  { %8 = vsyncpa [#allocation6], 0 }
   0x2   :  { %9 = vsyncpa [#allocation4], 0  ;;  %s283_s9 = smov [#allocation2]   ;;  %s211_s13 = scalar_lea.hbm %s351_s0, 256 }
   0x3   :  { %s21_s10 = sshll.u32 %s283_s9, 4  ;;  %p212_p0 = scmp.ne.s32.totalorder %s351_s0, %s211_s13  ;;  %s22_s10 = int_to_ptr.vmem [resolvable:$true] %s21_s10 }
   0x4   :  { %p215_p1 = scmp.lt.u32.totalorder %s211_s13, %s351_s0 }
   0x6   :  { %p217_p2 = pnand %p215_p1, %p212_p0 }
   0x8   :  { %220 = shalt.err (!%p217_p2)
}
   0x9   :  { %s221_s18 = scalar_lea.vmem %s22_s10, 256  ;;  %p226_p4 = scmp.lt.s32.totalorder %s22_s10, %s22_s10 }
   0xa   :  { %p222_p3 = scmp.ne.s32.totalorder %s22_s10, %s221_s18  ;;  %p227_p5 = scmp.lt.s32.totalorder %s221_s18, %s221_s18 }
   0xc   :  { %p228_p6 = por %p227_p5, %p226_p4 }
   0xe   :  { %p229_p7 = pnand %p228_p6, %p222_p3 }
  0x10   :  { %232 = shalt.err (!%p229_p7)
}
  0x11   :  { %s284_s19 = smov 128   ;;  %s285_s20 = smov 8  }
  0x12   :  { %27 = dma.hbm_to_vmem [thread:$0]  %s351_s0, 256, %s22_s10, [#allocation3], %s284_s19, %s284_s19, %s285_s20  }
  0x13   :  { %s286_s23 = smov [#allocation5]   ;;  %s233_s27 = scalar_lea.hbm %s352_s1, 256 }
  0x14   :  { %s39_s24 = sshll.u32 %s286_s23, 4  ;;  %p234_p8 = scmp.ne.s32.totalorder %s352_s1, %s233_s27  ;;  %s40_s24 = int_to_ptr.vmem [resolvable:$true] %s39_s24 }
  0x15   :  { %p237_p9 = scmp.lt.u32.totalorder %s233_s27, %s352_s1 }
  0x17   :  { %p239_p10 = pnand %p237_p9, %p234_p8 }
  0x19   :  { %242 = shalt.err (!%p239_p10)
}
  0x1a   :  { %s243_s4 = scalar_lea.vmem %s40_s24, 256  ;;  %p248_p12 = scmp.lt.s32.totalorder %s40_s24, %s40_s24 }
  0x1b   :  { %p244_p11 = scmp.ne.s32.totalorder %s40_s24, %s243_s4  ;;  %p249_p13 = scmp.lt.s32.totalorder %s243_s4, %s243_s4 }
  0x1d   :  { %p250_p0 = por %p249_p13, %p248_p12 }
  0x1f   :  { %p251_p1 = pnand %p250_p0, %p244_p11 }
  0x21   :  { %254 = shalt.err (!%p251_p1)
}
  0x22   :  { %45 = dma.hbm_to_vmem [thread:$0]  %s352_s1, 256, %s40_s24, [#allocation6], %s284_s19, %s284_s19, %s285_s20  }
  0x23   :  { %277 = dma.done.wait [#allocation3], 256  }
  0x24   :  { %278 = vsyncadd [#allocation3], 4294967040 }
  0x25   :  { %279 = dma.done.wait [#allocation6], 256  }
  0x26   :  { %280 = vsyncadd [#allocation6], 4294967040  ;;  %v327_v0 = vld [vmem:[#allocation2] sm:$0xff]  ;;  %v329_v1 = vld [vmem:[#allocation2 + $0x8] sm:$0xff]  ;;  %v146_v28 = vlaneseq  ;;  %s287_s1 = smov [#allocation7]  }
  0x27   :  { %v70_v2 = vand.u32 2147483647, %v327_v0  ;;  %v71_v3 = vand.u32 2147483647, %v329_v1  ;;  %vm114_vm0 = vcmp.ge.f32.partialorder %v327_v0, 0.0  ;;  %v68_v20 = vld [vmem:[#allocation5] sm:$0xff] }
  0x28   :  { %vm115_vm1 = vcmp.ge.f32.partialorder %v329_v1, 0.0  ;;  %v69_v22 = vld [vmem:[#allocation5 + $0x8] sm:$0xff]  ;;  %v147_v35 = vshrl.u32 %v146_v28, 7  ;;  %v78_v44 = vmax.f32 %v327_v0, 0.0  ;;  %v80_v45 = vmul.f32 %v68_v20, %v327_v0  ;;  %s173_s6 = sshll.u32 %s287_s1, 4  ;;  %s174_s6 = int_to_ptr.vmem [resolvable:$true] %s173_s6 }
  0x29   :  { %v72_v4 = vsub.f32 0.0, %v70_v2  ;;  %v73_v5 = vsub.f32 0.0, %v71_v3  ;;  %v79_v47 = vmax.f32 %v329_v1, 0.0  ;;  %v81_v48 = vmul.f32 %v69_v22, %v329_v1  ;;  %s255_s7 = scalar_lea.vmem %s174_s6, 128  ;;  %p260_p3 = scmp.lt.s32.totalorder %s174_s6, %s174_s6 }
  0x2a   :  { %v148_v46 = vadd.s32 8, %v147_v35  ;;  %v150_v53 = vand.u32 127, %v146_v28  ;;  %v155_v54 = vmul.u32 128, %v147_v35  ;;  %v82_v55 = vsub.f32 %v78_v44, %v80_v45  ;;  %p256_p2 = scmp.ne.s32.totalorder %s174_s6, %s255_s7  ;;  %p261_p4 = scmp.lt.s32.totalorder %s255_s7, %s255_s7 }
  0x2b   :  { %v74_v6 = vmul.f32 1.442695, %v72_v4  ;;  %v76_v7 = vmul.f32 1.442695, %v73_v5  ;;  %v83_v57 = vsub.f32 %v79_v47, %v81_v48 }
  0x2c   :  { %v156_v56 = vmul.u32 128, %v148_v46  ;;  %v157_v60 = vadd.s32 %v155_v54, %v150_v53  ;;  %p262_p5 = por %p261_p4, %p260_p3 }
  0x2d   :  { %195 = vpow2.f32 %v74_v6 }
  0x2e   :  { %197 = vpow2.f32 %v76_v7  ;;  %v158_v62 = vadd.s32 %v156_v56, %v150_v53  ;;  %vm160_vm4 = vcmp.lt.s32.totalorder %v157_v60, 2048  ;;  %p263_p6 = pnand %p262_p5, %p256_p2 }
  0x30   :  { %vm161_vm5 = vcmp.lt.s32.totalorder %v158_v62, 2048 }
  0x37   :  { %v196_v8 = vpop.eup %195 }
  0x38   :  { %v198_v9 = vpop.eup %197  ;;  %v84_v10 = vadd.f32 1.0, %v196_v8  ;;  %v87_v29 = vmul.f32 -0.5, %v196_v8  ;;  %v90_v39 = vand.u32 2147483647, %v196_v8 }
  0x39   :  { %v93_v11 = vadd.f32 1.0, %v198_v9  ;;  %v96_v31 = vmul.f32 -0.5, %v198_v9  ;;  %v99_v43 = vand.u32 2147483647, %v198_v9 }
  0x3a   :  { %199 = vrcp.f32 %v84_v10  ;;  %v88_v36 = vadd.f32 1.0, %v87_v29  ;;  %vm91_vm2 = vcmp.lt.f32.partialorder %v90_v39, 0.0004427343 }
  0x3b   :  { %201 = vrcp.f32 %v93_v11  ;;  %v97_v40 = vadd.f32 1.0, %v96_v31  ;;  %vm100_vm3 = vcmp.lt.f32.partialorder %v99_v43, 0.0004427343 }
  0x3c   :  { %203 = vlog2.f32 %v84_v10  ;;  %v89_v50 = vmul.f32 %v196_v8, %v88_v36 }
  0x3d   :  { %205 = vlog2.f32 %v93_v11  ;;  %v98_v52 = vmul.f32 %v198_v9, %v97_v40 }
  0x44   :  { %v200_v12 = vpop.eup %199 }
  0x45   :  { %v202_v13 = vpop.eup %201  ;;  %v108_v14 = vmul.f32 %v200_v12, %v84_v10 }
  0x46   :  { %v109_v15 = vmul.f32 %v202_v13, %v93_v11  ;;  %v204_v38 = vpop.eup %203 }
  0x47   :  { %v110_v16 = vsub.f32 2.0, %v108_v14  ;;  %v206_v42 = vpop.eup %205  ;;  %v86_v49 = vmul.f32 0.6931472, %v204_v38 }
  0x48   :  { %v111_v17 = vsub.f32 2.0, %v109_v15  ;;  %v95_v51 = vmul.f32 0.6931472, %v206_v42 }
  0x49   :  { %v112_v18 = vmul.f32 %v200_v12, %v110_v16  ;;  %v92_v58 = vsel %vm91_vm2, %v89_v50, %v86_v49 }
  0x4a   :  { %v113_v19 = vmul.f32 %v202_v13, %v111_v17  ;;  %v101_v59 = vsel %vm100_vm3, %v98_v52, %v95_v51  ;;  %v102_v61 = vadd.f32 %v92_v58, %v82_v55 }
  0x4b   :  { %v116_v21 = vmul.f32 %v196_v8, %v112_v18  ;;  %v103_v0 = vadd.f32 %v101_v59, %v83_v57 }
  0x4c   :  { %v117_v23 = vmul.f32 %v198_v9, %v113_v19 }
  0x4d   :  { %v118_v24 = vsel %vm114_vm0, %v112_v18, %v116_v21 }
  0x4e   :  { %v119_v25 = vsel %vm115_vm1, %v113_v19, %v117_v23  ;;  %v120_v26 = vsub.f32 %v118_v24, %v68_v20 }
  0x4f   :  { %v121_v27 = vsub.f32 %v119_v25, %v69_v22 }
  0x50   :  { %v187_v30 = vadd.f32 -1.0, %v120_v26 }
  0x51   :  { %v188_v32 = vadd.f32 -1.0, %v121_v27 }
  0x52   :  { %v124_v33 = vmul.f32 19.96008, %v187_v30 }
  0x53   :  { %v125_v34 = vmul.f32 19.96008, %v188_v32 }
  0x54   :  { %v126_v37 = vmul.f32 1.442695, %v124_v33 }
  0x55   :  { %v128_v41 = vmul.f32 1.442695, %v125_v34 }
  0x56   :  { %207 = vpow2.f32 %v126_v37 }
  0x57   :  { %209 = vpow2.f32 %v128_v41 }
  0x60   :  { %v208_v63 = vpop.eup %207 }
  0x61   :  { %v210_v2 = vpop.eup %209  ;;  %v130_v1 = vsub.f32 1.0, %v208_v63 }
  0x62   :  { %v131_v3 = vsub.f32 1.0, %v210_v2 }
  0x63   :  { %v132_v4 = vmul.f32 %v130_v1, %v102_v61 }
  0x64   :  { %v133_v5 = vmul.f32 %v131_v3, %v103_v0 }
  0x65   :  { %v162_v6 = vsel %vm160_vm4, %v132_v4, 0.0 }
  0x66   :  { %v163_v7 = vsel %vm161_vm5, %v133_v5, 0.0 }
  0x67   :  { %v164_v8 = vadd.f32 %v163_v7, %v162_v6 }
  0x69   :  { %166 = vst [vmem:[#allocation7] sm:$0xff] %v164_v8 }
  0x6a   :  { %266 = shalt.err (!%p263_p6)
}
  0x6b   :  { %s267_s10 = scalar_lea.hbm %s353_s2, 128 }
  0x6c   :  { %p268_p7 = scmp.ne.s32.totalorder %s353_s2, %s267_s10  ;;  %p271_p8 = scmp.lt.u32.totalorder %s267_s10, %s353_s2 }
  0x6e   :  { %p273_p9 = pnand %p271_p8, %p268_p7 }
  0x70   :  { %276 = shalt.err (!%p273_p9)
}
  0x71   :  { %176 = dma.vmem_to_hbm [thread:$0]  %s174_s6, 128, %s353_s2, [#allocation4]  }
  0x72   :  { %281 = dma.done.wait [#allocation4], 128  }
  0x73   :  { %282 = vsyncadd [#allocation4], 4294967168 }
  0x74   :  { %180 = vsyncpa [#allocation3], 1 }
  0x75   :  { %181 = vsyncpa [#allocation6], 1 }
  0x76   :  { %182 = vsyncpa [#allocation4], 1 }

</bundles_post_ra>
